<compile_context>
chip_gen: v5e
topology: v5e:2x2
jax: 0.10.0
libtpu: 0.0.40
codegen_flags: <defaults>
</compile_context>

<pallas_src>
import functools

import jax
import jax.numpy as jnp
from jax.experimental import pallas as pl
from jax.experimental.pallas import tpu as pltpu


def _conv_lrelu_kernel(p_ref, w_ref, b_ref, o_ref, *, negative_slope):
    # (TM, K) bf16 @ (K, O) bf16 on the MXU, f32 accumulation.
    acc = jnp.dot(p_ref[...], w_ref[...], preferred_element_type=jnp.float32)
    acc = acc + b_ref[0, :]                                   # f32 bias add (VPU)
    o_ref[...] = jnp.where(acc >= 0, acc, negative_slope * acc)


def _round_up(x, m):
    return ((x + m - 1) // m) * m


def _pick_tile_m(m_total, tile_m_max):
    # Big tiles amortize the per-grid-step pipeline overhead, but keep >= 2
    # tiles so the "parallel" axis can split across the two TensorCores on
    # v7x even for tiny inputs.  Tile stays a multiple of 8 (sublane rule for
    # the second-to-last block dim).
    if m_total <= 8:
        return 8
    half = _round_up(pl.cdiv(m_total, 2), 8)
    return max(8, min(tile_m_max, half))


def conv2d_leakyrelu(x_nchw, weight, bias, negative_slope=0.1, *, tile_m_max=1024):
    """x_nchw: (N, C, H, W) f32; weight: (O, C, KH, KW) f32; bias: (O,) f32.

    Returns NCHW f32, matching PyTorch Conv2d(stride=1, padding=0) + LeakyReLU.
    Matmul operands are cast to bf16; accumulation and epilogue stay f32.
    """
    N, C, H, W = x_nchw.shape
    O, Cw, KH, KW = weight.shape
    assert C == Cw
    OH, OW = H - KH + 1, W - KW + 1            # stride=1, padding=0

    # One layout change at the NCHW boundary + bf16 rounding BEFORE im2col so
    # the 49x patch intermediate is built and streamed at half width.
    x_nhwc = jnp.transpose(x_nchw, (0, 2, 3, 1)).astype(jnp.bfloat16)  # (N,H,W,C)

    # --- im2col directly in (kh, kw, c) K-order (no 5-D transpose) ---
    slices = [x_nhwc[:, kh:kh + OH, kw:kw + OW, :]            # each (N, OH, OW, C)
              for kh in range(KH) for kw in range(KW)]
    patches = jnp.concatenate(slices, axis=-1)                # (N, OH, OW, KH*KW*C)
    K = KH * KW * C
    m_total = N * OH * OW
    patches = patches.reshape(m_total, K)                     # (M, 147) bf16

    # Weight flattened with the matching (kh, kw, c) K-order -> (K, O), bf16.
    w2d = jnp.transpose(weight.astype(jnp.bfloat16), (2, 3, 1, 0)).reshape(K, O)
    b2d = bias.reshape(1, O).astype(jnp.float32)              # bias stays f32

    # Pad only M (to the tile).  K stays unpadded at 147: the last block dim
    # equals the full array dim (allowed), so no zero columns ever hit HBM.
    tile_m = _pick_tile_m(m_total, tile_m_max)
    m_pad = _round_up(m_total, tile_m)
    if m_pad != m_total:
        patches = jnp.pad(patches, ((0, m_pad - m_total), (0, 0)))

    kernel = functools.partial(_conv_lrelu_kernel, negative_slope=negative_slope)

    out2d = pl.pallas_call(
        kernel,
        out_shape=jax.ShapeDtypeStruct((m_pad, O), jnp.float32),
        grid_spec=pltpu.PrefetchScalarGridSpec(
            num_scalar_prefetch=0,
            grid=(m_pad // tile_m,),
            in_specs=[
                pl.BlockSpec((tile_m, K), lambda i: (i, 0)),   # patch row tile
                pl.BlockSpec((K, O), lambda i: (0, 0)),        # resident weight
                pl.BlockSpec((1, O), lambda i: (0, 0)),        # bias row
            ],
            out_specs=pl.BlockSpec((tile_m, O), lambda i: (i, 0)),
        ),
        compiler_params=pltpu.CompilerParams(
            dimension_semantics=("parallel",)),
    )(patches, w2d, b2d)

    # Lane-dense (O=128) kernel output; slice off M padding and do the single
    # NHWC->NCHW transpose the PyTorch-facing boundary requires.
    out = out2d[:m_total].reshape(N, OH, OW, O)
    return jnp.transpose(out, (0, 3, 1, 2))


if __name__ == "__main__":
    key = jax.random.PRNGKey(0)
    k_x, k_w, k_b = jax.random.split(key, 3)

    N, C, H, W = 2, 3, 16, 16
    O, KH, KW = 128, 7, 7
    slope = 0.1

    x = jax.random.normal(k_x, (N, C, H, W), dtype=jnp.float32)
    fan_in = C * KH * KW
    weight = jax.random.normal(k_w, (O, C, KH, KW), dtype=jnp.float32) / jnp.sqrt(fan_in)
    bias = jax.random.normal(k_b, (O,), dtype=jnp.float32) * 0.1

    out = conv2d_leakyrelu(x, weight, bias, negative_slope=slope)
    out = jax.block_until_ready(out)
    assert out.shape == (N, O, H - KH + 1, W - KW + 1)

    def ref_conv_lrelu(xq, wq):
        r = jax.lax.conv_general_dilated(
            xq, wq, window_strides=(1, 1), padding="VALID",
            dimension_numbers=("NCHW", "OIHW", "NCHW"),
            precision=jax.lax.Precision.HIGHEST)
        r = r + bias.reshape(1, O, 1, 1)
        return jnp.where(r >= 0, r, slope * r)

    # Tight check: reference computed with the same bf16-rounded operands and
    # f32 accumulation (kernel vs XLA differ only by summation order).
    x_q = x.astype(jnp.bfloat16).astype(jnp.float32)
    w_q = weight.astype(jnp.bfloat16).astype(jnp.float32)
    ref_q = ref_conv_lrelu(x_q, w_q)
    assert jnp.allclose(out, ref_q, atol=1e-4, rtol=1e-4)

    # Loose sanity check vs. the full-f32 module semantics (bf16 operand rounding).
    ref_f32 = ref_conv_lrelu(x, weight)
    assert jnp.allclose(out, ref_f32, atol=1e-1, rtol=1e-1)

    print("KERNEL_OK")
</pallas_src>

<mosaic_0001>
module attributes {stable_mosaic.version = 11 : i64} {
  func.func @_conv_lrelu_kernel(%arg0: i32, %arg1: memref<104x147xbf16, #tpu.memory_space<vmem>>, %arg2: memref<147x128xbf16, #tpu.memory_space<vmem>>, %arg3: memref<1x128xf32, #tpu.memory_space<vmem>>, %arg4: memref<104x128xf32, #tpu.memory_space<vmem>>) attributes {dimension_semantics = [#tpu.dimension_semantics<parallel>], iteration_bounds = array<i64: 2>, scalar_prefetch = 0 : i64, scratch_operands = 0 : i64, tpu.core_type = #tpu.core_type<tc>, window_params = [{transform_indices = @transform_0, window_bounds = array<i64: 104, 147>}, {pipeline_mode = #tpu.pipeline_mode<synchronous>, transform_indices = @transform_1, window_bounds = array<i64: 147, 128>}, {pipeline_mode = #tpu.pipeline_mode<synchronous>, transform_indices = @transform_2, window_bounds = array<i64: 1, 128>}, {transform_indices = @transform_3, window_bounds = array<i64: 104, 128>}]} {
    %c0 = arith.constant 0 : index
    %c0_0 = arith.constant 0 : index
    %0 = vector.load %arg1[%c0, %c0_0] : memref<104x147xbf16, #tpu.memory_space<vmem>>, vector<104x147xbf16>
    %c0_1 = arith.constant 0 : index
    %c0_2 = arith.constant 0 : index
    %1 = vector.load %arg2[%c0_1, %c0_2] : memref<147x128xbf16, #tpu.memory_space<vmem>>, vector<147x128xbf16>
    %cst = arith.constant dense<0.000000e+00> : vector<104x128xf32>
    %2 = tpu.matmul %0, %1, %cst {dimension_numbers = #tpu.dot_dimension_numbers<[1], [0], [0], [1], [0, 0, 1, 1], [], []>} : vector<104x147xbf16>, vector<147x128xbf16>, vector<104x128xf32> -> vector<104x128xf32>
    %c0_3 = arith.constant 0 : index
    %c0_4 = arith.constant 0 : index
    %3 = vector.load %arg3[%c0_3, %c0_4] : memref<1x128xf32, #tpu.memory_space<vmem>>, vector<1x128xf32>
    %4 = vector.shape_cast %3 : vector<1x128xf32> to vector<128xf32>
    %5 = vector.shape_cast %4 : vector<128xf32> to vector<1x128xf32>
    %6 = vector.broadcast %5 : vector<1x128xf32> to vector<104x128xf32>
    %7 = arith.addf %2, %6 : vector<104x128xf32>
    %cst_5 = arith.constant 0.000000e+00 : f32
    %8 = vector.broadcast %cst_5 : f32 to vector<104x128xf32>
    %9 = arith.cmpf oge, %7, %8 : vector<104x128xf32>
    %cst_6 = arith.constant 1.000000e-01 : f32
    %10 = vector.broadcast %cst_6 : f32 to vector<104x128xf32>
    %11 = arith.mulf %10, %7 : vector<104x128xf32>
    %12 = arith.select %9, %7, %11 : vector<104x128xi1>, vector<104x128xf32>
    %c0_7 = arith.constant 0 : index
    %c0_8 = arith.constant 0 : index
    %13 = vector.load %arg4[%c0_7, %c0_8] : memref<104x128xf32, #tpu.memory_space<vmem>>, vector<104x128xf32>
    tpu.vector_store %arg4[%c0_7, %c0_8], %12 {strides = array<i32>} : memref<104x128xf32, #tpu.memory_space<vmem>>, vector<104x128xf32>,
    return
  }
  func.func @transform_0(%arg0: i32) -> (i32, i32) {
    %c0_i32 = arith.constant 0 : i32
    %c0_i32_0 = arith.constant 0 : i32
    return %arg0, %c0_i32 : i32, i32
  }
  func.func @transform_1(%arg0: i32) -> (i32, i32) {
    %c0_i32 = arith.constant 0 : i32
    %c0_i32_0 = arith.constant 0 : i32
    %c0_i32_1 = arith.constant 0 : i32
    return %c0_i32, %c0_i32_0 : i32, i32
  }
  func.func @transform_2(%arg0: i32) -> (i32, i32) {
    %c0_i32 = arith.constant 0 : i32
    %c0_i32_0 = arith.constant 0 : i32
    %c0_i32_1 = arith.constant 0 : i32
    return %c0_i32, %c0_i32_0 : i32, i32
  }
  func.func @transform_3(%arg0: i32) -> (i32, i32) {
    %c0_i32 = arith.constant 0 : i32
    %c0_i32_0 = arith.constant 0 : i32
    return %arg0, %c0_i32 : i32, i32
  }
}

</mosaic_0001>

<bundles_post_ra>
// kernel: tpu_custom_call.1
= control target key start
LH: loop header
LB: loop body
LE: loop exit
PB: predicated region body
PF: predicated region fallthrough
CT: control target
= control target key end

     0   :  { %8 = vsyncpa [#allocation3], 0  ;;  %s1033_s0 = inlined_call_operand.vmem [shape: bf16[208,147], index: 0, kind: input, shape index: {}]   ;;  %s1034_s1 = inlined_call_operand.vmem [shape: bf16[147,128], index: 1, kind: input, shape index: {}]   ;;  %s1035_s2 = inlined_call_operand.vmem [shape: f32[1,128], index: 2, kind: input, shape index: {}]   ;;  %s1036_s3 = inlined_call_operand.hbm [shape: f32[208,128], index: 3, kind: output, shape index: {}]  }
   0x1   :  { %10 = vsyncpa [#allocation3 + $0x1], 0  ;;  %s838_s12 = smov 0   ;;  %s840_s13 = smov 0  }
   0x2   :  { %s842_s14 = smov 0   ;;  %s844_s15 = smov 0  }
   0x3 LB: > { %s859_s16 = sadd.s32 4294967295, %s813_s15   ;;  %s574_s17 = sadd.s32 4294967294, %s813_s15   ;;  %s813_s15 = sphi %s844_s15, %s1042_s15   ;;  %s809_s14 = sphi %s842_s14, %s1041_s14   ;;  %s805_s13 = sphi %s840_s13, %s1040_s13   ;;  %s801_s12 = sphi %s838_s12, %s1039_s12  }
   0x4   : > { %s863_s18 = sadd.s32 1, %s813_s15   ;;  %s91_s19 = sadd.s32 1, %s809_s14 }
   0x5   : > { %s88_s20 = ssub.s32 %s813_s15, %s863_s18  ;;  %p101_p0 = scmp.ne.s32.totalorder %s809_s14, %s805_s13 }
   0x6   : > { %p89_p1 = scmp.eq.s32.totalorder %s88_s20, 0  ;;  %p102_p2 = scmp.eq.s32.totalorder %s859_s16, 1 }
   0x7   : > { %p107_p3 = scmp.ne.s32.totalorder %s805_s13, %s801_s12  ;;  %p108_p4 = scmp.eq.s32.totalorder %s574_s17, 1 }
   0x8   : > { %s874_s21 = scalar_select %p89_p1, %s809_s14, %s91_s19  }
   0x9   : > { %p876_p5 = por %p102_p2, %p101_p0  ;;  %p880_p6 = por %p108_p4, %p107_p3 }
   0xa   : > { %p577_p7 = scmp.ge.s32.totalorder %s813_s15, 1  ;;  %p142_p8 = scmp.lt.s32.totalorder %s813_s15, 3 }
   0xc   : > { %p143_p9 = pnand %p577_p7, %p142_p8 }
   0xd   : > { %s167_s28 = smul.u32 (!%p143_p9), 13, %s859_s16  ;;  %s164_s6 = sand.u32 (!%p143_p9), 1, %s805_s13  }
   0xe   : > { %146 = sbr.rel (%p143_p9) target bundleno = 242 (0xf2), region = 32  ;;  %s497_s20 = scalar_lea.sflag (!%p143_p9), [#allocation3], %s164_s6 }
   0xf   : > { %p168_p10 = scmp.lt.s32.totalorder (!%p143_p9), %s167_s28, 25  ;;  %s707_s7 = smul.u32 (!%p143_p9), 104, %s164_s6 }
  0x10   : > { %s696_s9 = smul.u32 (!%p143_p9), 104, %s859_s16 }
  0x12   : > { %s508_s17 = scalar_lea.hbm (!%p143_p9), %s1036_s3, %s696_s9 }
  0x13   : > { %v694_v0 = vld [vmem:[%s1034_s1 + $0x38] sm:$0xff]  ;;  %v207_v1 = vld [vmem:[%s1034_s1 + $0x48] sm:$0x3]  ;;  %vm351_vm0 = vcmask 1040384   ;;  %vm352_vm1 = vcmask 1041408   ;;  %v693_v3 = vld [vmem:[%s1034_s1 + $0x30] sm:$0xff] }
  0x14   : > { %v309_v2 = vunpack.c.l.b16 %v207_v1  ;;  %358 = vmatpush.bf16.msra.mxu0 %v694_v0  ;;  %697 = vmatpush.bf16.msra.mxu2 %v694_v0  ;;  %v815_v4 = vmov 65535   ;;  %s1044_s28 = smov (!%p168_p10, %s167_s28), 25  ;;  %v692_v9 = vld [vmem:[%s1034_s1 + $0x28] sm:$0xff]  ;;  %v695_v10 = vld [vmem:[%s1034_s1 + $0x40] sm:$0xff]  ;;  %vm329_vm2 = vcmask 154624   ;;  %v690_v15 = vld [vmem:[%s1034_s1 + $0x18] sm:$0xff] }
  0x15   : > { %v353_v5 = vsel %vm351_vm0, 4294967295, %v815_v4  ;;  %s674_s8 = sshll.u32 %s1044_s28, 3  ;;  %v691_v14 = vld [vmem:[%s1034_s1 + $0x20] sm:$0xff]  ;;  %v689_v16 = vld [vmem:[%s1034_s1 + $0x10] sm:$0xff]  ;;  %v688_v20 = vld [vmem:[%s1034_s1 + $0x8] sm:$0xff]  ;;  %s511_s19 = sshll.u32 %s508_s17, 4  ;;  %s512_s19 = int_to_ptr.hbm [resolvable:$true] %s511_s19 }
  0x16   : > { %v319_v6 = vpack.c.b16 %v309_v2, %v309_v2  ;;  %v354_v7 = vsel %vm352_vm1, %v353_v5, 0  ;;  %s905_s11 = scalar_lea.vmem %s1033_s0, %s674_s8  ;;  %v687_v24 = vld [vmem:[%s1034_s1] sm:$0xff]  ;;  %s965_s8 = scalar_lea.vmem [#allocation2], %s707_s7 }
  0x17   : > { %v675_v11 = vld [vmem:[%s905_s11 + $0x4] sm:$0xf]  ;;  %v584_v12 = vld [vmem:[%s905_s11 + $0x8] sm:$0xf0]  ;;  %v685_v17 = vld [vmem:[%s905_s11 + $0x54] sm:$0xf] }
  0x18   : > { %v356_v8 = vand.u32 %v354_v7, %v319_v6  ;;  %359 = vmatpush.bf16.msra.mxu0 %v693_v3  ;;  %698 = vmatpush.bf16.msra.mxu2 %v693_v3  ;;  %v587_v13 = vor.u32 %v675_v11, %v584_v12  ;;  %v624_v18 = vld [vmem:[%s905_s11 + $0x58] sm:$0xf0]  ;;  %v677_v21 = vld [vmem:[%s905_s11 + $0x14] sm:$0xf]  ;;  %v582_v25 = vld [vmem:[%s905_s11] sm:$0xf] }
  0x19   : > { %v627_v19 = vor.u32 %v685_v17, %v624_v18  ;;  %v592_v22 = vld [vmem:[%s905_s11 + $0x18] sm:$0xf0]  ;;  %v676_v26 = vld [vmem:[%s905_s11 + $0x4] sm:$0xf0]  ;;  %v606_v27 = vld [vmem:[%s905_s11 + $0x30] sm:$0xf] }
  0x1a   : > { %407 = vmatpush.bf16.msra.mxu1 %v356_v8  ;;  %705 = vmatpush.bf16.msra.mxu3 %v356_v8  ;;  %v595_v23 = vor.u32 %v677_v21, %v592_v22  ;;  %v682_v28 = vld [vmem:[%s905_s11 + $0x34] sm:$0xf0]  ;;  %v583_v29 = vor.u32 %v676_v26, %v582_v25  ;;  %v188_v31 = vld [vmem:[%s905_s11 + $0x60] sm:$0xff]  ;;  %v600_v35 = vld [vmem:[%s905_s11 + $0x28] sm:$0xf0]  ;;  %s509_s16 = sshll.u32 %s965_s8, 4  ;;  %s510_s16 = int_to_ptr.vmem [resolvable:$true] %s509_s16 }
  0x1b   : > { %v607_v30 = vor.u32 %v682_v28, %v606_v27  ;;  %v250_v32 = vunpack.c.h.b16 %v188_v31  ;;  %v679_v34 = vld [vmem:[%s905_s11 + $0x24] sm:$0xf]  ;;  %v590_v37 = vld [vmem:[%s905_s11 + $0x10] sm:$0xf]  ;;  %v678_v38 = vld [vmem:[%s905_s11 + $0x14] sm:$0xf0]  ;;  %v249_v55 = vunpack.c.l.b16 %v188_v31 }
  0x1c   : > { %360 = vmatpush.bf16.msra.mxu0 %v692_v9  ;;  %699 = vmatpush.bf16.msra.mxu2 %v692_v9  ;;  %v603_v36 = vor.u32 %v679_v34, %v600_v35  ;;  %v614_v39 = vld [vmem:[%s905_s11 + $0x40] sm:$0xf]  ;;  %v684_v40 = vld [vmem:[%s905_s11 + $0x44] sm:$0xf0]  ;;  %v591_v41 = vor.u32 %v678_v38, %v590_v37  ;;  %v681_v43 = vld [vmem:[%s905_s11 + $0x34] sm:$0xf] }
  0x1d   : > { %v264_v33 = vpack.c.b16 %v250_v32, %v250_v32  ;;  %v615_v42 = vor.u32 %v684_v40, %v614_v39  ;;  %v608_v44 = vld [vmem:[%s905_s11 + $0x38] sm:$0xf0]  ;;  %v598_v46 = vld [vmem:[%s905_s11 + $0x20] sm:$0xf]  ;;  %v680_v47 = vld [vmem:[%s905_s11 + $0x24] sm:$0xf0]  ;;  %v263_v56 = vpack.c.b16 %v249_v55, %v249_v55 }
  0x1e   : > { %408 = vmatpush.bf16.msra.mxu1 %v695_v10  ;;  %706 = vmatpush.bf16.msra.mxu3 %v695_v10  ;;  %v611_v45 = vor.u32 %v681_v43, %v608_v44  ;;  %v622_v48 = vld [vmem:[%s905_s11 + $0x50] sm:$0xf]  ;;  %v686_v49 = vld [vmem:[%s905_s11 + $0x54] sm:$0xf0]  ;;  %v599_v50 = vor.u32 %v680_v47, %v598_v46  ;;  %v683_v52 = vld [vmem:[%s905_s11 + $0x44] sm:$0xf] }
  0x1f   : > { %v623_v51 = vor.u32 %v686_v49, %v622_v48  ;;  %v616_v53 = vld [vmem:[%s905_s11 + $0x48] sm:$0xf0]  ;;  %v957_v60 = vld [vmem:[%s1035_s2] ss:$0 sm:$0xff]  ;;  %s765_s24 = sshra.s32 %s512_s19, 4  ;;  %s771_s28 = scalar_lea.hbm %s1036_s3, 208  ;;  %s766_s24 = int_to_ptr.hbm [resolvable:$true] %s765_s24 }
  0x20   : > { %361 = vmatpush.bf16.msra.mxu0 %v691_v14  ;;  %700 = vmatpush.bf16.msra.mxu2 %v691_v14  ;;  %v619_v54 = vor.u32 %v683_v52, %v616_v53  ;;  %s767_s25 = scalar_lea.hbm %s766_s24, 104  ;;  %p772_p0 = scmp.lt.s32.totalorder %s766_s24, %s1036_s3 }
  0x21   : > { %664 = vmatmul.msk.bf16.vlgmr.msra.gmra.mxu1 %vm329_vm2, %v587_v13  ;;  %669 = vmatmul.msk.bf16.vlgmr.msra.gmra.mxu3 %vm329_vm2, %v627_v19  ;;  %p768_p11 = scmp.ne.s32.totalorder %s766_s24, %s767_s25  ;;  %p773_p1 = scmp.lt.s32.totalorder %s771_s28, %s767_s25 }
  0x23   : > { %p769_p12 = pnand %p768_p11, %p876_p5  ;;  %p774_p2 = por %p773_p1, %p772_p0 }
  0x24   : > { %362 = vmatpush.bf16.msra.mxu0 %v690_v15  ;;  %701 = vmatpush.bf16.msra.mxu2 %v690_v15 }
  0x25   : > { %p770_p13 = pneg %p769_p12 }
  0x27   : > { %p775_p3 = pnand %p774_p2, %p770_p13 }
  0x28   : > { %363 = vmatpush.bf16.msra.mxu0 %v689_v16  ;;  %702 = vmatpush.bf16.msra.mxu2 %v689_v16 }
  0x2c   : > { %364 = vmatpush.bf16.msra.mxu0 %v688_v20  ;;  %703 = vmatpush.bf16.msra.mxu2 %v688_v20 }
  0x30   : > { %365 = vmatpush.bf16.msra.mxu0 %v687_v24  ;;  %704 = vmatpush.bf16.msra.mxu2 %v687_v24 }
  0x31   : > { %665 = vmatmul.msk.bf16.gmra.mxu1 %vm329_vm2, %v595_v23  ;;  %670 = vmatmul.msk.bf16.gmra.mxu3 %vm329_vm2, %v264_v33 }
  0x33   : > { %366 = vmatmul.bf16.vlgmr.msra.gmra.mxu0 %v583_v29  ;;  %381 = vmatmul.bf16.vlgmr.msra.gmra.mxu2 %v607_v30 }
  0x41   : > { %666 = vmatmul.msk.bf16.gmra.mxu1 %vm329_vm2, %v603_v36 }
  0x43   : > { %371 = vmatmul.bf16.gmra.mxu0 %v591_v41  ;;  %386 = vmatmul.bf16.gmra.mxu2 %v615_v42 }
  0x51   : > { %667 = vmatmul.msk.bf16.gmra.mxu1 %vm329_vm2, %v611_v45 }
  0x53   : > { %376 = vmatmul.bf16.gmra.mxu0 %v599_v50  ;;  %391 = vmatmul.bf16.gmra.mxu2 %v623_v51 }
  0x61   : > { %668 = vmatmul.msk.bf16.gmra.mxu1 %vm329_vm2, %v619_v54 }
  0x63   : > { %396 = vmatmul.bf16.gmra.mxu2 %v263_v56 }
  0x9e   : > { %v410_v57 = vpop.f32.mrf.mxu1 }
  0xa4   : > { %v960_v62 = vpop.f32.mrf.mxu3 }
  0xa6   : > { %v412_v58 = vpop.f32.mrf.mxu1 }
  0xac   : > { %v968_v6 = vpop.f32.mrf.mxu3 }
  0xae   : > { %v415_v59 = vpop.f32.mrf.mxu1 }
  0xb0   : > { %v367_v61 = vpop.f32.mrf.mxu0 }
  0xb1   : > { %v368_v63 = vadd.f32 %v957_v60, %v367_v61 }
  0xb3   : > { %v411_v0 = vadd.f32 %v410_v57, %v368_v63 }
  0xb4   : > { %v972_v14 = vpop.f32.mrf.mxu3 }
  0xb5   : > { %vm444_vm3 = vcmp.ge.f32.partialorder %v411_v0, 0.0  ;;  %v457_v1 = vmul.f32 0.1, %v411_v0 }
  0xb6   : > { %v417_v2 = vpop.f32.mrf.mxu1  ;;  %v382_v4 = vpop.f32.mrf.mxu2 }
  0xb7   : > { %v470_v3 = vsel %vm444_vm3, %v411_v0, %v457_v1  ;;  %v383_v25 = vadd.f32 %v957_v60, %v382_v4 }
  0xb8   : > { %483 = vst [vmem:[%s965_s8] sm:$0xff] %v470_v3  ;;  %v369_v5 = vpop.f32.mrf.mxu0 }
  0xb9   : > { %v370_v7 = vadd.f32 %v957_v60, %v369_v5 }
  0xbb   : > { %v413_v8 = vadd.f32 %v412_v58, %v370_v7 }
  0xbc   : > { %v442_v22 = vpop.f32.mrf.mxu3 }
  0xbd   : > { %vm445_vm4 = vcmp.ge.f32.partialorder %v413_v8, 0.0  ;;  %v458_v9 = vmul.f32 0.1, %v413_v8 }
  0xbe   : > { %v420_v10 = vpop.f32.mrf.mxu1  ;;  %v384_v12 = vpop.f32.mrf.mxu2 }
  0xbf   : > { %v471_v11 = vsel %vm445_vm4, %v413_v8, %v458_v9  ;;  %v385_v36 = vadd.f32 %v957_v60, %v384_v12 }
  0xc0   : > { %484 = vst [vmem:[%s965_s8 + $0x8] sm:$0xff] %v471_v11  ;;  %v372_v13 = vpop.f32.mrf.mxu0 }
  0xc1   : > { %v373_v15 = vadd.f32 %v957_v60, %v372_v13 }
  0xc3   : > { %v416_v16 = vadd.f32 %v415_v59, %v373_v15 }
  0xc5   : > { %vm446_vm5 = vcmp.ge.f32.partialorder %v416_v16, 0.0  ;;  %v459_v17 = vmul.f32 0.1, %v416_v16 }
  0xc6   : > { %v422_v18 = vpop.f32.mrf.mxu1  ;;  %v387_v20 = vpop.f32.mrf.mxu2 }
  0xc7   : > { %v472_v19 = vsel %vm446_vm5, %v416_v16, %v459_v17  ;;  %v388_v49 = vadd.f32 %v957_v60, %v387_v20 }
  0xc8   : > { %485 = vst [vmem:[%s965_s8 + $0x10] sm:$0xff] %v472_v19  ;;  %v374_v21 = vpop.f32.mrf.mxu0 }
  0xc9   : > { %v375_v23 = vadd.f32 %v957_v60, %v374_v21 }
  0xcb   : > { %v418_v24 = vadd.f32 %v417_v2, %v375_v23 }
  0xcd   : > { %vm447_vm6 = vcmp.ge.f32.partialorder %v418_v24, 0.0  ;;  %v460_v26 = vmul.f32 0.1, %v418_v24 }
  0xce   : > { %v425_v27 = vpop.f32.mrf.mxu1  ;;  %v389_v30 = vpop.f32.mrf.mxu2 }
  0xcf   : > { %v426_v28 = vadd.f32 %v425_v27, %v383_v25  ;;  %v473_v29 = vsel %vm447_vm6, %v418_v24, %v460_v26 }
  0xd0   : > { %486 = vst [vmem:[%s965_s8 + $0x18] sm:$0xff] %v473_v29  ;;  %v377_v32 = vpop.f32.mrf.mxu0 }
  0xd1   : > { %vm450_vm7 = vcmp.ge.f32.partialorder %v426_v28, 0.0  ;;  %v463_v31 = vmul.f32 0.1, %v426_v28  ;;  %v378_v33 = vadd.f32 %v957_v60, %v377_v32 }
  0xd3   : > { %v476_v34 = vsel %vm450_vm7, %v426_v28, %v463_v31  ;;  %v421_v35 = vadd.f32 %v420_v10, %v378_v33 }
  0xd4   : > { %489 = vst [vmem:[%s965_s8 + $0x30] sm:$0xff] %v476_v34 }
  0xd5   : > { %vm448_vm8 = vcmp.ge.f32.partialorder %v421_v35, 0.0  ;;  %v461_v37 = vmul.f32 0.1, %v421_v35 }
  0xd6   : > { %v427_v38 = vpop.f32.mrf.mxu1  ;;  %v392_v41 = vpop.f32.mrf.mxu2 }
  0xd7   : > { %v428_v39 = vadd.f32 %v427_v38, %v385_v36  ;;  %v474_v40 = vsel %vm448_vm8, %v421_v35, %v461_v37  ;;  %v393_v43 = vadd.f32 %v957_v60, %v392_v41 }
  0xd8   : > { %487 = vst [vmem:[%s965_s8 + $0x20] sm:$0xff] %v474_v40  ;;  %v379_v44 = vpop.f32.mrf.mxu0 }
  0xd9   : > { %vm451_vm9 = vcmp.ge.f32.partialorder %v428_v39, 0.0  ;;  %v464_v42 = vmul.f32 0.1, %v428_v39  ;;  %v380_v45 = vadd.f32 %v957_v60, %v379_v44  ;;  %v436_v47 = vadd.f32 %v960_v62, %v393_v43 }
  0xda   : > { %v390_v62 = vadd.f32 %v957_v60, %v389_v30 }
  0xdb   : > { %v477_v46 = vsel %vm451_vm9, %v428_v39, %v464_v42  ;;  %v423_v48 = vadd.f32 %v422_v18, %v380_v45  ;;  %vm454_vm10 = vcmp.ge.f32.partialorder %v436_v47, 0.0  ;;  %v467_v50 = vmul.f32 0.1, %v436_v47 }
  0xdc   : > { %490 = vst [vmem:[%s965_s8 + $0x38] sm:$0xff] %v477_v46 }
  0xdd   : > { %vm449_vm11 = vcmp.ge.f32.partialorder %v423_v48, 0.0  ;;  %v462_v51 = vmul.f32 0.1, %v423_v48  ;;  %v480_v53 = vsel %vm454_vm10, %v436_v47, %v467_v50 }
  0xde   : > { %v430_v52 = vpop.f32.mrf.mxu1  ;;  %493 = vst [vmem:[%s965_s8 + $0x50] sm:$0xff] %v480_v53  ;;  %v394_v56 = vpop.f32.mrf.mxu2 }
  0xdf   : > { %v431_v54 = vadd.f32 %v430_v52, %v388_v49  ;;  %v475_v55 = vsel %vm449_vm11, %v423_v48, %v462_v51  ;;  %v395_v58 = vadd.f32 %v957_v60, %v394_v56 }
  0xe0   : > { %488 = vst [vmem:[%s965_s8 + $0x28] sm:$0xff] %v475_v55 }
  0xe1   : > { %vm452_vm12 = vcmp.ge.f32.partialorder %v431_v54, 0.0  ;;  %v465_v57 = vmul.f32 0.1, %v431_v54  ;;  %v438_v61 = vadd.f32 %v968_v6, %v395_v58 }
  0xe3   : > { %v478_v59 = vsel %vm452_vm12, %v431_v54, %v465_v57  ;;  %vm455_vm13 = vcmp.ge.f32.partialorder %v438_v61, 0.0  ;;  %v468_v63 = vmul.f32 0.1, %v438_v61 }
  0xe4   : > { %491 = vst [vmem:[%s965_s8 + $0x40] sm:$0xff] %v478_v59 }
  0xe5   : > { %v481_v1 = vsel %vm455_vm13, %v438_v61, %v468_v63 }
  0xe6   : > { %v432_v0 = vpop.f32.mrf.mxu1  ;;  %494 = vst [vmem:[%s965_s8 + $0x58] sm:$0xff] %v481_v1  ;;  %v397_v3 = vpop.f32.mrf.mxu2 }
  0xe7   : > { %v433_v2 = vadd.f32 %v432_v0, %v390_v62  ;;  %v398_v5 = vadd.f32 %v957_v60, %v397_v3 }
  0xe9   : > { %vm453_vm14 = vcmp.ge.f32.partialorder %v433_v2, 0.0  ;;  %v466_v4 = vmul.f32 0.1, %v433_v2  ;;  %v441_v7 = vadd.f32 %v972_v14, %v398_v5 }
  0xeb   : > { %v479_v6 = vsel %vm453_vm14, %v433_v2, %v466_v4  ;;  %vm456_vm15 = vcmp.ge.f32.partialorder %v441_v7, 0.0  ;;  %v469_v8 = vmul.f32 0.1, %v441_v7 }
  0xec   : > { %492 = vst [vmem:[%s965_s8 + $0x48] sm:$0xff] %v479_v6 }
  0xed   : > { %v482_v9 = vsel %vm456_vm15, %v441_v7, %v469_v8 }
  0xee   : > { %495 = vst [vmem:[%s965_s8 + $0x60] sm:$0xff] %v482_v9  ;;  %v399_v10 = vpop.f32.mrf.mxu2 }
  0xef   : > { %778 = shalt.err (!%p775_p3)
}
  0xf0   : > { %s816_s4 = smov 128   ;;  %s817_s5 = smov 8  }
  0xf1   : > { %708 = dma.vmem_to_hbm [thread:$0]  (%p876_p5), %s510_s16, 1664, %s512_s19, %s497_s20, %s816_s4, %s816_s4, %s817_s5  }
  0xf2 PF: > { %p714_p4 = scmp.ge.s32.totalorder %s813_s15, 2  ;;  %s526_s6 = sand.u32 1, %s801_s12  }
  0xf3   : > { %s527_s7 = scalar_lea.sflag [#allocation3], %s526_s6 }
  0xf4   : > { %p711_p7 = pnand %p714_p4, %p880_p6 }
  0xf6   : > { %p712_p8 = pneg %p711_p7 }
  0xf8   : > { %796 = dma.done.wait (%p712_p8), %s527_s7, 1664  }
  0xf9   : > { %798 = vsyncadd (%p712_p8), %s527_s7, 4294965632  ;;  %p13_p9 = scmp.ge.s32.totalorder %s863_s18, 4   ;;  %s1039_s12 = smov %s805_s13 }
  0xfa   : > { %s1040_s13 = smov %s809_s14  ;;  %s1041_s14 = smov %s874_s21 }
  0xfb   : > { %s1042_s15 = smov %s863_s18  ;;  %15 = sbr.rel (!%p13_p9) target bundleno = 3 (0x3), region = 67 }
 0x100   :  { %533 = vsyncpa [#allocation3], 1 }
 0x101   :  { %535 = vsyncpa [#allocation3 + $0x1], 1 }

</bundles_post_ra>
